<compile_context>
chip_gen: v7x
topology: tpu7x:2x2x1
jax: 0.10.0
libtpu: 0.0.40
codegen_flags: <defaults>
</compile_context>

<pallas_src>
import jax
import jax.numpy as jnp
from jax.experimental import pallas as pl
from jax.experimental.pallas import tpu as pltpu


def _round_up(x, m):
    return ((x + m - 1) // m) * m


def _saliency_kernel(w_ref, b_ref, x_ref, o_ref):
    # w_ref: SMEM (C,) f32, b_ref: SMEM (1,) f32
    # x_ref: VMEM (1, C, TS, 128) native dtype, o_ref: VMEM (1, TS, 128)
    C = x_ref.shape[1]
    # VPU FMA chain over channels: each channel row is upcast to f32
    # individually (no full-tile widening; safe for bf16 inputs on v5e too),
    # accumulate in f32, tanh + bias in f32, cast only on the final store.
    acc = w_ref[0] * x_ref[0, 0, :, :].astype(jnp.float32)
    for c in range(1, C):  # C is static; typical channel counts fully unroll
        acc = acc + w_ref[c] * x_ref[0, c, :, :].astype(jnp.float32)
    o_ref[0, :, :] = jnp.tanh(acc + b_ref[0]).astype(o_ref.dtype)


def saliency_map_generator(x, weight, bias, *, ts_target=32,
                           vmem_input_budget=24 * 1024 * 1024):
    """x: (N, C, H, W); weight: (1, C, 1, 1); bias: (1,). Returns (N, 1, H, W)."""
    N, C, H, W = x.shape
    HW = H * W
    itemsize = jnp.dtype(x.dtype).itemsize

    # Spatial extent expressed in rows of 128 lanes.
    s_raw = pl.cdiv(HW, 128)

    # Tile size (in 128-lane rows): aim ~4096 lanes per step, but keep the
    # double-buffered input block within the VMEM budget (re-derived from C
    # and dtype, so the same code also fits v7x's smaller 64 MiB VMEM).
    ts_budget = vmem_input_budget // (2 * C * 128 * itemsize)
    ts_budget = max(8, (ts_budget // 8) * 8)
    ts = min(ts_target, ts_budget)
    if s_raw <= ts:
        ts = s_raw                       # full-extent block: no (8,128) rule
        s_tot = s_raw
    else:
        s_tot = _round_up(s_raw, ts)     # ts is a multiple of 8 here
    hw_pad = s_tot * 128

    x_flat = x.reshape(N, C, HW)
    if hw_pad != HW:
        x_flat = jnp.pad(x_flat, ((0, 0), (0, 0), (0, hw_pad - HW)))
    x4 = x_flat.reshape(N, C, s_tot, 128)

    w1d = weight.reshape(C).astype(jnp.float32)   # C scalars -> SMEM
    b1d = bias.reshape(1).astype(jnp.float32)     # 1 scalar  -> SMEM

    # Explicit scoped-VMEM limit sized from the chosen tiles (with margin),
    # clamped so it stays safe on all generations (incl. v7x's 64 MiB).
    block_in_bytes = C * ts * 128 * itemsize
    block_out_bytes = ts * 128 * itemsize
    vmem_limit = min(48 * 1024 * 1024,
                     max(16 * 1024 * 1024,
                         4 * (block_in_bytes + block_out_bytes)))

    out = pl.pallas_call(
        _saliency_kernel,
        out_shape=jax.ShapeDtypeStruct((N, s_tot, 128), x.dtype),
        grid_spec=pltpu.PrefetchScalarGridSpec(
            num_scalar_prefetch=0,
            grid=(N, s_tot // ts),
            in_specs=[
                pl.BlockSpec(memory_space=pltpu.MemorySpace.SMEM),   # weight (C,)
                pl.BlockSpec(memory_space=pltpu.MemorySpace.SMEM),   # bias (1,)
                pl.BlockSpec((1, C, ts, 128), lambda n, t: (n, 0, t, 0)),
            ],
            out_specs=pl.BlockSpec((1, ts, 128), lambda n, t: (n, t, 0)),
        ),
        compiler_params=pltpu.CompilerParams(
            dimension_semantics=("parallel", "parallel"),
            vmem_limit_bytes=int(vmem_limit)),
    )(w1d, b1d, x4)

    out_flat = out.reshape(N, hw_pad)[:, :HW]
    return out_flat.reshape(N, 1, H, W)


if __name__ == "__main__":
    # Small, deterministic setup consistent with the module's forward.
    N, C, H, W = 2, 4, 16, 16
    key = jax.random.PRNGKey(0)
    kx, kw, kb = jax.random.split(key, 3)

    x = jax.random.normal(kx, (N, C, H, W), dtype=jnp.float32)
    # Deterministic synthetic Conv2d(C, 1, kernel_size=1) parameters.
    weight = jax.random.normal(kw, (1, C, 1, 1), dtype=jnp.float32) * 0.1
    bias = jax.random.normal(kb, (1,), dtype=jnp.float32) * 0.1

    out = saliency_map_generator(x, weight, bias)
    out = jax.block_until_ready(out)

    # Pure-JAX reference (1x1 conv == channel contraction) for sanity check.
    ref = jnp.tanh(
        jnp.einsum("nchw,c->nhw", x, weight.reshape(C)) + bias[0]
    )[:, None, :, :]
    assert out.shape == (N, 1, H, W)
    assert jnp.allclose(out, ref, atol=1e-5, rtol=1e-5)

    print("KERNEL_OK")
</pallas_src>

<mosaic_0001>
module attributes {stable_mosaic.version = 11 : i64} {
  func.func @_saliency_kernel(%arg0: i32, %arg1: i32, %arg2: memref<4xf32, #tpu.memory_space<smem>>, %arg3: memref<1xf32, #tpu.memory_space<smem>>, %arg4: memref<1x4x2x128xf32, #tpu.memory_space<vmem>>, %arg5: memref<1x2x128xf32, #tpu.memory_space<vmem>>) attributes {dimension_semantics = [#tpu.dimension_semantics<parallel>, #tpu.dimension_semantics<parallel>], iteration_bounds = array<i64: 2, 1>, scalar_prefetch = 0 : i64, scratch_operands = 0 : i64, tpu.core_type = #tpu.core_type<tc>, window_params = [{transform_indices = @transform_0, window_bounds = array<i64: 4>}, {transform_indices = @transform_1, window_bounds = array<i64: 1>}, {transform_indices = @transform_2, window_bounds = array<i64: 1, 4, 2, 128>}, {transform_indices = @transform_3, window_bounds = array<i64: 1, 2, 128>}]} {
    %c0 = arith.constant 0 : index
    %0 = memref.load %arg2[%c0] : memref<4xf32, #tpu.memory_space<smem>>
    %c0_0 = arith.constant 0 : index
    %c0_1 = arith.constant 0 : index
    %c0_2 = arith.constant 0 : index
    %c0_3 = arith.constant 0 : index
    %1 = vector.load %arg4[%c0_0, %c0_1, %c0_2, %c0_3] : memref<1x4x2x128xf32, #tpu.memory_space<vmem>>, vector<1x1x2x128xf32>
    %2 = vector.shape_cast %1 : vector<1x1x2x128xf32> to vector<2x128xf32>
    %3 = vector.broadcast %0 : f32 to vector<2x128xf32>
    %4 = arith.mulf %3, %2 : vector<2x128xf32>
    %c1 = arith.constant 1 : index
    %5 = memref.load %arg2[%c1] : memref<4xf32, #tpu.memory_space<smem>>
    %c0_4 = arith.constant 0 : index
    %c1_5 = arith.constant 1 : index
    %c0_6 = arith.constant 0 : index
    %c0_7 = arith.constant 0 : index
    %6 = vector.load %arg4[%c0_4, %c1_5, %c0_6, %c0_7] : memref<1x4x2x128xf32, #tpu.memory_space<vmem>>, vector<1x1x2x128xf32>
    %7 = vector.shape_cast %6 : vector<1x1x2x128xf32> to vector<2x128xf32>
    %8 = vector.broadcast %5 : f32 to vector<2x128xf32>
    %9 = arith.mulf %8, %7 : vector<2x128xf32>
    %10 = arith.addf %4, %9 : vector<2x128xf32>
    %c2 = arith.constant 2 : index
    %11 = memref.load %arg2[%c2] : memref<4xf32, #tpu.memory_space<smem>>
    %c0_8 = arith.constant 0 : index
    %c2_9 = arith.constant 2 : index
    %c0_10 = arith.constant 0 : index
    %c0_11 = arith.constant 0 : index
    %12 = vector.load %arg4[%c0_8, %c2_9, %c0_10, %c0_11] : memref<1x4x2x128xf32, #tpu.memory_space<vmem>>, vector<1x1x2x128xf32>
    %13 = vector.shape_cast %12 : vector<1x1x2x128xf32> to vector<2x128xf32>
    %14 = vector.broadcast %11 : f32 to vector<2x128xf32>
    %15 = arith.mulf %14, %13 : vector<2x128xf32>
    %16 = arith.addf %10, %15 : vector<2x128xf32>
    %c3 = arith.constant 3 : index
    %17 = memref.load %arg2[%c3] : memref<4xf32, #tpu.memory_space<smem>>
    %c0_12 = arith.constant 0 : index
    %c3_13 = arith.constant 3 : index
    %c0_14 = arith.constant 0 : index
    %c0_15 = arith.constant 0 : index
    %18 = vector.load %arg4[%c0_12, %c3_13, %c0_14, %c0_15] : memref<1x4x2x128xf32, #tpu.memory_space<vmem>>, vector<1x1x2x128xf32>
    %19 = vector.shape_cast %18 : vector<1x1x2x128xf32> to vector<2x128xf32>
    %20 = vector.broadcast %17 : f32 to vector<2x128xf32>
    %21 = arith.mulf %20, %19 : vector<2x128xf32>
    %22 = arith.addf %16, %21 : vector<2x128xf32>
    %c0_16 = arith.constant 0 : index
    %23 = memref.load %arg3[%c0_16] : memref<1xf32, #tpu.memory_space<smem>>
    %24 = vector.broadcast %23 : f32 to vector<2x128xf32>
    %25 = arith.addf %22, %24 : vector<2x128xf32>
    %26 = math.tanh %25 : vector<2x128xf32>
    %c0_17 = arith.constant 0 : index
    %c0_18 = arith.constant 0 : index
    %c0_19 = arith.constant 0 : index
    %27 = vector.load %arg5[%c0_17, %c0_18, %c0_19] : memref<1x2x128xf32, #tpu.memory_space<vmem>>, vector<1x2x128xf32>
    %28 = vector.shape_cast %27 : vector<1x2x128xf32> to vector<2x128xf32>
    %29 = vector.shape_cast %26 : vector<2x128xf32> to vector<1x2x128xf32>
    tpu.vector_store %arg5[%c0_17, %c0_18, %c0_19], %29 {strides = array<i32>} : memref<1x2x128xf32, #tpu.memory_space<vmem>>, vector<1x2x128xf32>,
    return
  }
  func.func @transform_0(%arg0: i32, %arg1: i32) -> i32 {
    %c0_i32 = arith.constant 0 : i32
    %c0_i32_0 = arith.constant 0 : i32
    return %c0_i32 : i32
  }
  func.func @transform_1(%arg0: i32, %arg1: i32) -> i32 {
    %c0_i32 = arith.constant 0 : i32
    %c0_i32_0 = arith.constant 0 : i32
    return %c0_i32 : i32
  }
  func.func @transform_2(%arg0: i32, %arg1: i32) -> (i32, i32, i32, i32) {
    %c0_i32 = arith.constant 0 : i32
    %c0_i32_0 = arith.constant 0 : i32
    %c0_i32_1 = arith.constant 0 : i32
    return %arg0, %c0_i32, %arg1, %c0_i32_0 : i32, i32, i32, i32
  }
  func.func @transform_3(%arg0: i32, %arg1: i32) -> (i32, i32, i32) {
    %c0_i32 = arith.constant 0 : i32
    %c0_i32_0 = arith.constant 0 : i32
    return %arg0, %arg1, %c0_i32 : i32, i32, i32
  }
}

</mosaic_0001>

<bundles_post_ra>
// kernel: tpu_custom_call.1
= control target key start
LH: loop header
LB: loop body
LE: loop exit
PB: predicated region body
PF: predicated region fallthrough
CT: control target
= control target key end

     0   :  { %s828_s0 = inlined_call_operand.vmem [shape: f32[4], index: 0, kind: input, shape index: {}]   ;;  %s829_s1 = inlined_call_operand.<no memory space> [shape: f32[1], index: 1, kind: input, shape index: {}]   ;;  %s830_s2 = inlined_call_operand.hbm [shape: f32[2,4,2,128], index: 2, kind: input, shape index: {}]   ;;  %s831_s3 = inlined_call_operand.hbm [shape: f32[2,2,128], index: 3, kind: output, shape index: {}]  }
   0x1   :  { %8 = sst [smem:[#allocation2]] %s829_s1 }
   0x2   :  { %9 = vsyncpa [#allocation6], 0 }
   0x3   :  { %10 = vsyncpa [#allocation4], 0 }
   0x4   :  { %12 = vsyncpa [#allocation4 + $0x1], 0 }
   0x5   :  { %13 = vsyncpa [#allocation5], 0 }
   0x6   :  { %15 = vsyncpa [#allocation5 + $0x1], 0  ;;  %s617_s14 = smov 0   ;;  %s619_s15 = smov 0  }
   0x7   :  { %s621_s16 = smov 0   ;;  %s623_s17 = smov 0  }
   0x8   :  { %s625_s18 = smov 0   ;;  %s627_s19 = smov 0  }
   0x9 LB: > { %s356_s1 = sadd.s32 4294967295, %s587_s19   ;;  %s357_s20 = sadd.s32 4294967294, %s587_s19   ;;  %s587_s19 = sphi %s627_s19, %s21_s19   ;;  %s583_s18 = sphi %s625_s18, %s854_s18   ;;  %s579_s17 = sphi %s623_s17, %s853_s17   ;;  %s575_s16 = sphi %s621_s16, %s852_s16   ;;  %s571_s15 = sphi %s619_s15, %s851_s15   ;;  %s567_s14 = sphi %s617_s14, %s850_s14  }
   0xa   : > { %s84_s21 = sadd.s32 1, %s575_s16  ;;  %p91_p0 = scmp.ne.s32.totalorder %s575_s16, %s571_s15 }
   0xb   : > { %p92_p1 = scmp.eq.s32.totalorder %s587_s19, 0  ;;  %p97_p2 = scmp.ne.s32.totalorder %s571_s15, %s567_s14 }
   0xc   : > { %p655_p3 = scmp.eq.s32.totalorder %s356_s1, 0  ;;  %p123_p4 = scmp.eq.s32.totalorder %s356_s1, 1 }
   0xd   : > { %p659_p5 = por %p92_p1, %p91_p0  ;;  %p129_p6 = scmp.eq.s32.totalorder %s357_s20, 1 }
   0xe   : > { %s836_s22 = scalar_select %p655_p3, 1, 0 }
   0xf   : > { %p665_p7 = por %p655_p3, %p97_p2  ;;  %p669_p8 = por %p123_p4, %p91_p0 }
  0x10   : > { %p673_p9 = por %p129_p6, %p97_p2  ;;  %p358_p10 = scmp.ge.s32.totalorder %s587_s19, 1 }
  0x11   : > { %s838_s24 = scalar_select %p665_p7, 1, 0 }
  0x12   : > { %s839_s25 = scalar_select %p669_p8, 1, 0 }
  0x13   : > { %s840_s26 = scalar_select %p673_p9, 1, 0 }
  0x14   : > { %p136_p11 = scmp.lt.s32.totalorder %s587_s19, 3  ;;  %s149_s29 = sshll.u32 %s828_s0, 4  ;;  %s150_s29 = int_to_ptr.vmem [resolvable:$true] %s149_s29 }
  0x15   : > { %p400_p0 = scmp.lt.s32.totalorder %s587_s19, 2  ;;  %s33_s6 = sadd.s32 1, %s583_s18 }
  0x16   : > { %p682_p12 = pnand %p358_p10, %p136_p11  ;;  %p703_p6 = scmp.ge.s32.totalorder %s33_s6, 2 }
  0x17   : > { %p692_p2 = pnand %p400_p0, %p659_p5  ;;  %s163_s8 = sand.u32 1, %s575_s16  }
  0x18   : > { %p387_p1 = pneg %p682_p12  ;;  %s456_s9 = scalar_lea.vmem %s150_s29, 16 }
  0x19   : > { %p457_p10 = scmp.ne.s32.totalorder %s150_s29, %s456_s9  ;;  %p464_p13 = scmp.lt.s32.totalorder %s150_s29, %s150_s29 }
  0x1a   : > { %p698_p4 = pnand %p387_p1, %p655_p3  ;;  %p465_p9 = scmp.lt.s32.totalorder %s456_s9, %s456_s9 }
  0x1c   : > { %p458_p11 = pneg %p698_p4  ;;  %p466_p8 = por %p465_p9, %p464_p13 }
  0x1e   : > { %p459_p5 = pnand %p458_p11, %p457_p10 }
  0x20   : > { %p460_p0 = pneg %p459_p5 }
  0x22   : > { %p467_p1 = pnand %p466_p8, %p460_p0 }
  0x24   : > { %470 = shalt.err (!%p467_p1)
}
  0x25   : > { %s589_s10 = smov [#allocation3]   ;;  %s856_s6 = smov (%p703_p6, %s33_s6), 0 }
  0x26   : > { %390 = dma.vmem_to_smem (!%p698_p4), %s150_s29, 16, %s589_s10, [#allocation6]  }
  0x27   : > { %s361_s11 = sshll.u32 %s163_s8, 3  ;;  %s79_s12 = ssub.s32 %s583_s18, %s856_s6 }
  0x28   : > { %p82_p9 = scmp.eq.s32.totalorder %s79_s12, 0  ;;  %s378_s13 = sshll.u32 %s583_s18, 7 }
  0x29   : > { %s722_s23 = scalar_lea.hbm %s830_s2, %s378_s13  ;;  %s167_s27 = scalar_lea.vmem [#allocation7], %s361_s11 }
  0x2a   : > { %s175_s28 = sshll.u32 %s167_s27, 4  ;;  %s731_s5 = scalar_lea.sflag [#allocation4], %s163_s8  ;;  %s729_s28 = int_to_ptr.vmem [resolvable:$true] %s175_s28 }
  0x2b   : > { %s727_s29 = scalar_select %p82_p9, %s575_s16, %s84_s21  }
  0x2c   : > { %s471_s7 = scalar_lea.hbm %s722_s23, 128  ;;  %p473_p13 = pneg %p692_p2 }
  0x2d   : > { %p472_p8 = scmp.ne.s32.totalorder %s722_s23, %s471_s7  ;;  %s476_s11 = scalar_lea.hbm %s830_s2, 256 }
  0x2e   : > { %p477_p10 = scmp.lt.u32.totalorder %s722_s23, %s830_s2  ;;  %p478_p11 = scmp.lt.u32.totalorder %s476_s11, %s471_s7 }
  0x2f   : > { %p474_p4 = pnand %p473_p13, %p472_p8  ;;  %p480_p0 = scmp.lt.u32.totalorder %s471_s7, %s722_s23 }
  0x30   : > { %p479_p5 = por %p478_p11, %p477_p10 }
  0x31   : > { %p475_p6 = pneg %p474_p4 }
  0x32   : > { %p481_p1 = por %p480_p0, %p479_p5 }
  0x34   : > { %p482_p9 = pnand %p481_p1, %p475_p6 }
  0x36   : > { %485 = shalt.err (!%p482_p9)
}
  0x37   : > { %s486_s21 = scalar_lea.vmem %s729_s28, 128  ;;  %s590_s8 = smov [#allocation7]  }
  0x38   : > { %p487_p8 = scmp.ne.s32.totalorder %s729_s28, %s486_s21  ;;  %s491_s1 = sshll.u32 %s590_s8, 4  ;;  %s492_s1 = int_to_ptr.vmem [resolvable:$false] %s491_s1 }
  0x39   : > { %s493_s20 = scalar_lea.vmem %s492_s1, 256  ;;  %p494_p3 = scmp.lt.s32.totalorder %s729_s28, %s492_s1 }
  0x3a   : > { %p489_p4 = pnand %p487_p8, %p473_p13  ;;  %p495_p10 = scmp.lt.s32.totalorder %s493_s20, %s486_s21 }
  0x3c   : > { %p490_p7 = pneg %p489_p4  ;;  %p496_p11 = por %p495_p10, %p494_p3 }
  0x3e   : > { %p497_p5 = pnand %p496_p11, %p490_p7 }
  0x40   : > { %500 = shalt.err (!%p497_p5)
}
  0x41   : > { %s591_s27 = smov 32   ;;  %s592_s7 = smov 2  }
  0x42   : > { %394 = dma.hbm_to_vmem [thread:$0]  (!%p692_p2), %s722_s23, 128, %s729_s28, %s731_s5, %s591_s27, %s591_s27, %s592_s7  }
  0x43   : > { %187 = sbr.rel (%p682_p12) target bundleno = 123 (0x7b), region = 32  ;;  %p845_p13 = scmp.ne.s32.totalorder (!%p682_p12), %s836_s22, 0 }
  0x4a   : > { %554 = dma.done.wait (%p845_p13), [#allocation6], 16  }
  0x4b   : > { %556 = vsyncadd (%p845_p13), [#allocation6], 4294967280  ;;  %s766_s9 = sand.u32 1, %s571_s15   ;;  %p846_p3 = scmp.ne.s32.totalorder %s838_s24, 0 }
  0x4c   : > { %s366_s10 = sshll.u32 %s766_s9, 3  ;;  %s194_s11 = scalar_lea.sflag [#allocation4], %s766_s9 }
  0x4d   : > { %s197_s12 = scalar_lea.vmem [#allocation7], %s366_s10 }
  0x4e   : > { %558 = dma.done.wait (%p846_p3), %s194_s11, 128  }
  0x4f   : > { %560 = vsyncadd (%p846_p3), %s194_s11, 4294967168 }
  0x50   : > { %202 = sfence }
  0x51   : > { %s221_s30 = sld [smem:[#allocation3]]  ;;  %s368_s4 = sld [smem:[#allocation3 + $0x1]]  ;;  %v222_v0 = vld [vmem:[%s197_s12] sm:$0x3]  ;;  %v369_v1 = vld [vmem:[%s197_s12 + $0x2] sm:$0x3] }
  0x52   : > { %s370_s23 = sld [smem:[#allocation3 + $0x2]]  ;;  %s372_s22 = sld [smem:[#allocation3 + $0x3]]  ;;  %v371_v3 = vld [vmem:[%s197_s12 + $0x4] sm:$0x3]  ;;  %v373_v6 = vld [vmem:[%s197_s12 + $0x6] sm:$0x3] }
  0x53   : > { %s243_s28 = sld [smem:[#allocation2]]  ;;  %s367_s24 = sshll.u32 %s766_s9, 1 }
  0x54   : > { %s220_s5 = scalar_lea.vmem [#allocation8], %s367_s24  ;;  %s375_s21 = sshll.u32 %s579_s17, 5 }
  0x55   : > { %s263_s13 = sshll.u32 %s220_s5, 4  ;;  %s781_s20 = scalar_lea.hbm %s831_s3, %s375_s21  ;;  %s776_s13 = int_to_ptr.vmem [resolvable:$true] %s263_s13 }
  0x56   : > { %s249_s27 = scalar_lea.sflag [#allocation5], %s766_s9  ;;  %s501_s7 = scalar_lea.vmem %s776_s13, 32 }
  0x57   : > { %v223_v2 = vstv %s221_s30  ;;  %v228_v5 = vstv %s368_s4  ;;  %p502_p7 = scmp.ne.s32.totalorder %s776_s13, %s501_s7  ;;  %p847_p12 = scmp.ne.s32.totalorder %s839_s25, 0 }
  0x58   : > { %v224_v4 = vmul.f32 %v223_v2, %v222_v0  ;;  %v229_v7 = vmul.f32 %v369_v1, %v228_v5  ;;  %v234_v8 = vstv %s370_s23  ;;  %v240_v9 = vstv %s372_s22  ;;  %s593_s10 = smov [#allocation8]  }
  0x59   : > { %v235_v10 = vmul.f32 %v371_v3, %v234_v8  ;;  %v241_v12 = vmul.f32 %v373_v6, %v240_v9  ;;  %v244_v14 = vstv %s243_s28  ;;  %p503_p2 = pnand %p502_p7, %p847_p12  ;;  %s505_s17 = sshll.u32 %s593_s10, 4  ;;  %s506_s17 = int_to_ptr.vmem [resolvable:$false] %s505_s17 }
  0x5a   : > { %v230_v11 = vadd.f32 %v229_v7, %v224_v4  ;;  %s507_s11 = scalar_lea.vmem %s506_s17, 64  ;;  %p508_p0 = scmp.lt.s32.totalorder %s776_s13, %s506_s17 }
  0x5b   : > { %p504_p6 = pneg %p503_p2  ;;  %p509_p1 = scmp.lt.s32.totalorder %s507_s11, %s501_s7 }
  0x5c   : > { %v236_v13 = vadd.f32 %v235_v10, %v230_v11 }
  0x5d   : > { %p510_p9 = por %p509_p1, %p508_p0 }
  0x5e   : > { %v242_v15 = vadd.f32 %v241_v12, %v236_v13 }
  0x5f   : > { %p511_p8 = pnand %p510_p9, %p504_p6 }
  0x60   : > { %v245_v16 = vadd.f32 %v244_v14, %v242_v15 }
  0x62   : > { %454 = vtanh.f32 %v245_v16 }
  0x6c   : > { %v455_v17 = vpop.eup %454 }
  0x6d   : > { %247 = vst [vmem:[%s220_s5] sm:$0x3] %v455_v17 }
  0x6e   : > { %514 = shalt.err (!%p511_p8)
}
  0x6f   : > { %s515_s9 = scalar_lea.hbm %s781_s20, 32  ;;  %s519_s4 = scalar_lea.hbm %s831_s3, 64 }
  0x70   : > { %p516_p4 = scmp.ne.s32.totalorder %s781_s20, %s515_s9  ;;  %p520_p5 = scmp.lt.u32.totalorder %s781_s20, %s831_s3 }
  0x71   : > { %p521_p13 = scmp.lt.u32.totalorder %s519_s4, %s515_s9  ;;  %p523_p7 = scmp.lt.u32.totalorder %s515_s9, %s781_s20 }
  0x72   : > { %p517_p10 = pnand %p516_p4, %p847_p12 }
  0x73   : > { %p522_p3 = por %p521_p13, %p520_p5 }
  0x74   : > { %p518_p11 = pneg %p517_p10 }
  0x75   : > { %p524_p2 = por %p523_p7, %p522_p3 }
  0x77   : > { %p525_p6 = pnand %p524_p2, %p518_p11 }
  0x79   : > { %528 = shalt.err (!%p525_p6)
}
  0x7a   : > { %385 = dma.vmem_to_hbm [thread:$0]  (%p847_p12), %s776_s13, 32, %s781_s20, %s249_s27  }
  0x7b PF: > { %s275_s28 = sand.u32 1, %s567_s14   ;;  %p848_p0 = scmp.ne.s32.totalorder %s840_s26, 0 }
  0x7c   : > { %p849_p1 = scmp.ge.s32.totalorder %s587_s19, 2  ;;  %s276_s24 = scalar_lea.sflag [#allocation5], %s275_s28 }
  0x7e   : > { %p396_p9 = pnand %p849_p1, %p848_p0 }
  0x80   : > { %562 = dma.done.wait (!%p396_p9), %s276_s24, 32  }
  0x81   : > { %564 = vsyncadd (!%p396_p9), %s276_s24, 4294967264  ;;  %s21_s19 = sadd.s32 1, %s587_s19   ;;  %s850_s14 = smov %s571_s15 }
  0x82   : > { %p18_p8 = scmp.ge.s32.totalorder %s21_s19, 4   ;;  %s851_s15 = smov %s575_s16 }
  0x83   : > { %s852_s16 = smov %s727_s29  ;;  %s853_s17 = smov %s583_s18 }
  0x84   : > { %s854_s18 = smov %s856_s6  ;;  %20 = sbr.rel (!%p18_p8) target bundleno = 9 (0x9), region = 85 }
  0x8b   :  { %281 = vsyncpa [#allocation4], 1 }
  0x8c   :  { %283 = vsyncpa [#allocation4 + $0x1], 1 }
  0x8d   :  { %284 = vsyncpa [#allocation5], 1 }
  0x8e   :  { %286 = vsyncpa [#allocation5 + $0x1], 1 }
  0x8f   :  { %287 = vsyncpa [#allocation6], 1 }
  0x90   :  { %289 = vsyncpa [#allocation6 + $0x1], 1 }

</bundles_post_ra>
